<compile_context>
chip_gen: v6e
topology: v6e:2x2x1
jax: 0.10.0
libtpu: 0.0.40
codegen_flags: <defaults>
</compile_context>

<pallas_src>
import jax
import jax.numpy as jnp
from jax.experimental import pallas as pl
from jax.experimental.pallas import tpu as pltpu


def _identity_kernel(x_ref, o_ref, pin_ref):
    # o_ref aliases x_ref's HBM buffer (input_output_aliases={0: 0}); the data
    # is already in place, so nothing is loaded or stored from/to the tensors.
    # A trivial SMEM scratch store keeps the kernel body non-empty and lowers /
    # discharges cleanly on every backend (replaces the unsupported
    # pltpu.touch ordering pin).
    del x_ref, o_ref
    pin_ref[0] = jnp.int32(0)


def identity_pallas(x: jax.Array) -> jax.Array:
    """Identity forward pass: zero-copy Pallas kernel (output aliases input).

    For zero data movement in a real model, call this under
    jax.jit(..., donate_argnums=...) (or on a dead intermediate) so the input
    buffer is donatable; otherwise XLA adds one defensive HBM->HBM copy.
    """
    if x.size == 0:
        return x  # degenerate empty tensor: nothing to alias

    return pl.pallas_call(
        _identity_kernel,
        out_shape=jax.ShapeDtypeStruct(x.shape, x.dtype),
        in_specs=[pl.BlockSpec(memory_space=pl.ANY)],   # leave input in HBM
        out_specs=pl.BlockSpec(memory_space=pl.ANY),    # output stays in HBM
        scratch_shapes=[pltpu.SMEM((1,), jnp.int32)],   # 1-word pin, no data moved
        input_output_aliases={0: 0},                    # output buffer == input buffer
        cost_estimate=pl.CostEstimate(
            flops=0, transcendentals=0, bytes_accessed=0),
    )(x)


if __name__ == "__main__":
    key = jax.random.PRNGKey(0)
    # Small NCHW input consistent with typical conv-feature usage.
    x = jax.random.normal(key, (2, 4, 16, 16), dtype=jnp.float32)

    y = identity_pallas(x)
    y = jax.block_until_ready(y)

    assert y.shape == x.shape, (y.shape, x.shape)
    assert y.dtype == x.dtype, (y.dtype, x.dtype)
    assert jnp.array_equal(y, x), "Identity kernel output mismatch"

    print("KERNEL_OK")
</pallas_src>

<mosaic_0001>
module attributes {stable_mosaic.version = 11 : i64} {
  func.func @_identity_kernel(%arg0: memref<2x4x16x16xf32, #tpu.memory_space<any>>, %arg1: memref<2x4x16x16xf32, #tpu.memory_space<any>>, %arg2: memref<1xi32, #tpu.memory_space<smem>>) attributes {dimension_semantics = [], scalar_prefetch = 0 : i64, scratch_operands = 1 : i64, tpu.core_type = #tpu.core_type<tc>} {
    %c0_i32 = arith.constant 0 : i32
    %c0 = arith.constant 0 : index
    %0 = memref.load %arg2[%c0] : memref<1xi32, #tpu.memory_space<smem>>
    memref.store %c0_i32, %arg2[%c0] : memref<1xi32, #tpu.memory_space<smem>>
    return
  }
}

</mosaic_0001>

<bundles_post_ra>
// kernel: tpu_custom_call.1
= control target key start
LH: loop header
LB: loop body
LE: loop exit
PB: predicated region body
PF: predicated region fallthrough
CT: control target
= control target key end

     0   :  { %s18_s0 = inlined_call_operand.hbm [shape: f32[2,4,16,16], index: 0, kind: input, shape index: {}, may-alias: {0,1}]   ;;  %s19_s1 = inlined_call_operand.hbm [shape: f32[2,4,16,16], index: 1, kind: output, shape index: {}, may-alias: {0,1}]  }

</bundles_post_ra>
